<compile_context>
chip_gen: v6e
topology: v6e:2x2x1
jax: 0.10.0
libtpu: 0.0.40
codegen_flags: <defaults>
</compile_context>

<pallas_src>
import math
import functools

import jax
import jax.numpy as jnp
from jax.experimental import pallas as pl
from jax.experimental.pallas import tpu as pltpu


# ---------------------------------------------------------------------------
# Kernel: one full EncoderBlock forward for TB batch elements (R = TB*S rows).
# ---------------------------------------------------------------------------
def encoder_block_kernel(x_ref,
                         qkv_w_ref, qkv_b_ref,
                         o_w_ref, o_b_ref,
                         ln1_g_ref, ln1_b_ref,
                         l1_w_ref, l1_b_ref,
                         l2_w_ref, l2_b_ref,
                         ln2_g_ref, ln2_b_ref,
                         out_ref,
                         *, num_heads, tb, seq_len, approx_recip):
    cdt = qkv_w_ref.dtype            # matmul input dtype (bf16 or f32)
    eps = 1e-5
    H = num_heads

    x_in = x_ref[...]                # (R, E), activation dtype
    x = x_in.astype(jnp.float32)     # f32 copy for residual / LayerNorm math
    R, E = x_in.shape
    hd = E // H

    def mm(a, w):                    # MXU matmul, f32 accumulation
        return jnp.dot(a.astype(cdt), w, preferred_element_type=jnp.float32)

    # ----- QKV projection.  Weight columns are [Q_heads | K_heads | V_heads]
    # (re-packed in the wrapper); 1/sqrt(hd) is folded into the Q panel.
    # Cast the whole (R, 3E) activation to the matmul dtype exactly once. -----
    qkv = (mm(x_in, qkv_w_ref[...]) + qkv_b_ref[...]).astype(cdt)     # (R, 3E)

    def split_heads(panel):          # (R, E) -> (tb*H, S, hd)
        return (panel.reshape(tb, seq_len, H, hd)
                .transpose(0, 2, 1, 3)
                .reshape(tb * H, seq_len, hd))

    q = split_heads(qkv[:, :E])
    k = split_heads(qkv[:, E:2 * E])
    v = split_heads(qkv[:, 2 * E:])

    # ----- batched attention over all heads at once -----
    logits = jnp.einsum('bqd,bkd->bqk', q, k,
                        preferred_element_type=jnp.float32)           # (tb*H, S, S)
    m = jnp.max(logits, axis=-1, keepdims=True)
    e = jnp.exp(logits - m)
    s = jnp.sum(e, axis=-1, keepdims=True)
    if approx_recip:
        p = e * pl.reciprocal(s, approx=True)
    else:
        p = e / s
    vals = jnp.einsum('bqk,bkd->bqd', p.astype(cdt), v,
                      preferred_element_type=jnp.float32)             # (tb*H, S, hd)

    # ----- merge heads and do ONE full-E output projection -----
    vals2d = (vals.reshape(tb, H, seq_len, hd)
              .transpose(0, 2, 1, 3)
              .reshape(R, E))
    attn_out = mm(vals2d, o_w_ref[...]) + o_b_ref[...]                # (R, E) f32

    # ----- residual + LayerNorm 1 (dropout = identity, eval mode) -----
    x1 = x + attn_out
    mu1 = jnp.mean(x1, axis=-1, keepdims=True)
    xc1 = x1 - mu1
    var1 = jnp.mean(xc1 * xc1, axis=-1, keepdims=True)
    x1 = xc1 * jax.lax.rsqrt(var1 + eps) * ln1_g_ref[...] + ln1_b_ref[...]

    # ----- feed-forward: Linear -> ReLU -> Linear (dropout = identity) -----
    h1 = jnp.maximum(mm(x1, l1_w_ref[...]) + l1_b_ref[...], 0.0).astype(cdt)
    ff = mm(h1, l2_w_ref[...]) + l2_b_ref[...]

    # ----- residual + LayerNorm 2 -----
    x2 = x1 + ff
    mu2 = jnp.mean(x2, axis=-1, keepdims=True)
    xc2 = x2 - mu2
    var2 = jnp.mean(xc2 * xc2, axis=-1, keepdims=True)
    y = xc2 * jax.lax.rsqrt(var2 + eps) * ln2_g_ref[...] + ln2_b_ref[...]
    out_ref[...] = y.astype(out_ref.dtype)


# ---------------------------------------------------------------------------
# Hardware / tiling helpers.
# ---------------------------------------------------------------------------
def _vmem_capacity_bytes():
    """Physical VMEM capacity; conservative (v7x-sized) fallback."""
    try:
        info = pltpu.get_tpu_info()
        cap = getattr(info, "vmem_capacity_bytes", None)
        if cap:
            return int(cap)
    except Exception:
        pass
    return 64 * 2 ** 20


@functools.lru_cache(maxsize=1)
def _single_buffer_supported():
    """One-time probe with a tiny dummy kernel for pipeline_mode=pl.Buffered(1)."""
    if not hasattr(pl, "Buffered"):
        return False
    try:
        spec = pl.BlockSpec((8, 128), lambda i: (0, 0),
                            pipeline_mode=pl.Buffered(1))

        def _probe(w_ref, o_ref):
            o_ref[...] = w_ref[...] + 1.0

        f = pl.pallas_call(
            _probe,
            out_shape=jax.ShapeDtypeStruct((8, 128), jnp.float32),
            grid=(2,),
            in_specs=[spec],
            out_specs=pl.BlockSpec((8, 128), lambda i: (0, 0)),
        )
        jax.block_until_ready(f(jnp.zeros((8, 128), jnp.float32)))
        return True
    except Exception:
        return False


def _act_vmem_bytes(tb, S, E, F, H):
    """Rough per-step activation working-set estimate (bytes)."""
    R = tb * S
    return (4 * R * E * 4              # double-buffered in + out blocks
            + R * 3 * E * 6            # qkv f32 result + matmul-dtype copy
            + 3 * tb * H * S * S * 4   # logits / exp / probs
            + 2 * R * E * 6            # per-head vals + merged copy
            + R * F * 6                # FFN hidden f32 + bf16
            + 4 * R * E * 4)           # residual / LayerNorm temps


def _pick_batch_tile(B, S, E, F, H, act_budget, row_target):
    divisors = [d for d in range(1, B + 1) if B % d == 0]
    ok = [tb for tb in divisors if (tb * S) % 8 == 0 or tb == B]
    if not ok:
        ok = [B]
    fitting = [tb for tb in ok if _act_vmem_bytes(tb, S, E, F, H) <= act_budget]
    if not fitting:
        fitting = [min(ok, key=lambda tb: _act_vmem_bytes(tb, S, E, F, H))]
    # Prefer >= 2 grid steps so the "parallel" axis can use both v7x cores.
    multi = [tb for tb in fitting if B // tb >= 2]
    pool = multi if (B >= 2 and multi) else fitting
    capped = [tb for tb in pool if tb * S <= row_target]
    return max(capped) if capped else min(pool)


# ---------------------------------------------------------------------------
# One pallas_call per EncoderBlock, grid over batch tiles.
# ---------------------------------------------------------------------------
def _encoder_block_call(x2d, p, *, num_heads, tb, seq_len, approx_recip,
                        single_buffer, vmem_limit):
    R_total, E = x2d.shape
    R = tb * seq_len
    n_steps = R_total // R

    kernel = functools.partial(encoder_block_kernel,
                               num_heads=num_heads, tb=tb, seq_len=seq_len,
                               approx_recip=approx_recip)

    args = (x2d,
            p["qkv_w"], p["qkv_b"], p["o_w"], p["o_b"],
            p["ln1_g"], p["ln1_b"], p["l1_w"], p["l1_b"],
            p["l2_w"], p["l2_b"], p["ln2_g"], p["ln2_b"])

    def wspec(a):
        idx = lambda i: (0, 0)     # resident weights: constant block
        if single_buffer:
            return pl.BlockSpec(a.shape, idx, pipeline_mode=pl.Buffered(1))
        return pl.BlockSpec(a.shape, idx)

    in_specs = ([pl.BlockSpec((R, E), lambda i: (i, 0))]
                + [wspec(a) for a in args[1:]])

    return pl.pallas_call(
        kernel,
        out_shape=jax.ShapeDtypeStruct((R_total, E), x2d.dtype),
        grid=(n_steps,),
        in_specs=in_specs,
        out_specs=pl.BlockSpec((R, E), lambda i: (i, 0)),
        compiler_params=pltpu.CompilerParams(
            dimension_semantics=("parallel",),      # batch tiles are independent
            vmem_limit_bytes=int(vmem_limit)),
    )(*args)


@functools.partial(jax.jit, static_argnames=(
    "num_heads", "tb", "seq_len", "act_dtype_name", "approx_recip",
    "single_buffer", "vmem_limit"))
def _forward(x, prepared, *, num_heads, tb, seq_len, act_dtype_name,
             approx_recip, single_buffer, vmem_limit):
    B, S, E = x.shape
    act_dtype = jnp.dtype(act_dtype_name)
    x2d = x.reshape(B * S, E).astype(act_dtype)
    for p in prepared:
        x2d = _encoder_block_call(x2d, p, num_heads=num_heads, tb=tb,
                                  seq_len=seq_len, approx_recip=approx_recip,
                                  single_buffer=single_buffer,
                                  vmem_limit=vmem_limit)
    return x2d.reshape(B, S, E).astype(jnp.float32)


# ---------------------------------------------------------------------------
# Parameter preparation (torch layout -> kernel layout) -- done once.
# ---------------------------------------------------------------------------
def prepare_layer_params(pt, num_heads, matmul_dtype=jnp.bfloat16):
    E = pt["o_w"].shape[0]
    hd = E // num_heads
    scale = 1.0 / math.sqrt(hd)
    f32 = jnp.float32

    # torch qkv_proj packs outputs per head as [q_h | k_h | v_h].  Regroup rows
    # to [Q_all_heads | K_all_heads | V_all_heads] and fold the attention scale
    # into the Q panel (weight + bias) -- free at runtime.
    w = pt["qkv_w"].reshape(num_heads, 3, hd, E).transpose(1, 0, 2, 3).reshape(3 * E, E)
    b = pt["qkv_b"].reshape(num_heads, 3, hd).transpose(1, 0, 2).reshape(3 * E)
    w = w.at[:E].multiply(scale)
    b = b.at[:E].multiply(scale)

    return dict(
        qkv_w=jnp.asarray(w.T, matmul_dtype),                 # (E, 3E)
        qkv_b=jnp.asarray(b, f32).reshape(1, 3 * E),
        o_w=jnp.asarray(pt["o_w"].T, matmul_dtype),           # (E, E)
        o_b=jnp.asarray(pt["o_b"], f32).reshape(1, E),
        l1_w=jnp.asarray(pt["l1_w"].T, matmul_dtype),         # (E, F)
        l1_b=jnp.asarray(pt["l1_b"], f32).reshape(1, -1),
        l2_w=jnp.asarray(pt["l2_w"].T, matmul_dtype),         # (F, E)
        l2_b=jnp.asarray(pt["l2_b"], f32).reshape(1, -1),
        ln1_g=jnp.asarray(pt["ln1_g"], f32).reshape(1, E),
        ln1_b=jnp.asarray(pt["ln1_b"], f32).reshape(1, E),
        ln2_g=jnp.asarray(pt["ln2_g"], f32).reshape(1, E),
        ln2_b=jnp.asarray(pt["ln2_b"], f32).reshape(1, E),
    )


def transformer_encoders(x, torch_layer_params, num_heads,
                         matmul_dtype=jnp.bfloat16):
    B, S, E = x.shape
    F = torch_layer_params[0]["l1_w"].shape[0]

    prepared = tuple(prepare_layer_params(pt, num_heads, matmul_dtype)
                     for pt in torch_layer_params)

    single_buffer = _single_buffer_supported()
    cap = _vmem_capacity_bytes()
    budget = int(0.80 * cap)                       # valid on v7x (64 MiB) too
    per_layer_w = sum(int(a.size) * a.dtype.itemsize
                      for a in prepared[0].values())
    weight_resident = per_layer_w * (1 if single_buffer else 2)
    act_budget = max(budget - weight_resident, 4 * 2 ** 20)
    row_target = 512 if cap <= 64 * 2 ** 20 else 1024

    tb = _pick_batch_tile(B, S, E, F, num_heads, act_budget, row_target)
    vmem_limit = int(min(budget,
                         max(32 * 2 ** 20,
                             weight_resident
                             + _act_vmem_bytes(tb, S, E, F, num_heads))))

    approx_recip = jnp.dtype(matmul_dtype) == jnp.dtype(jnp.bfloat16)
    act_dtype_name = jnp.dtype(matmul_dtype).name   # carry activations in matmul dtype

    return _forward(x, prepared, num_heads=num_heads, tb=tb, seq_len=S,
                    act_dtype_name=act_dtype_name, approx_recip=approx_recip,
                    single_buffer=single_buffer, vmem_limit=vmem_limit)


# ---------------------------------------------------------------------------
# Deterministic parameter init in torch layout (shapes per the PyTorch module).
# ---------------------------------------------------------------------------
def _xavier_uniform(key, shape):
    fan_out, fan_in = shape                  # torch nn.Linear weight is (out, in)
    bound = math.sqrt(6.0 / (fan_in + fan_out))
    return jax.random.uniform(key, shape, jnp.float32, -bound, bound)


def init_encoder_block_params(key, embed_dim, dim_feedforward):
    E, Fd = embed_dim, dim_feedforward
    ks = jax.random.split(key, 6)
    qkv_w = _xavier_uniform(ks[0], (3 * E, E))
    o_w = _xavier_uniform(ks[1], (E, E))
    b1 = 1.0 / math.sqrt(E)
    l1_w = jax.random.uniform(ks[2], (Fd, E), jnp.float32, -b1, b1)
    l1_b = jax.random.uniform(ks[3], (Fd,), jnp.float32, -b1, b1)
    b2 = 1.0 / math.sqrt(Fd)
    l2_w = jax.random.uniform(ks[4], (E, Fd), jnp.float32, -b2, b2)
    l2_b = jax.random.uniform(ks[5], (E,), jnp.float32, -b2, b2)
    return dict(
        qkv_w=qkv_w, qkv_b=jnp.zeros((3 * E,), jnp.float32),
        o_w=o_w, o_b=jnp.zeros((E,), jnp.float32),
        l1_w=l1_w, l1_b=l1_b, l2_w=l2_w, l2_b=l2_b,
        ln1_g=jnp.ones((E,), jnp.float32), ln1_b=jnp.zeros((E,), jnp.float32),
        ln2_g=jnp.ones((E,), jnp.float32), ln2_b=jnp.zeros((E,), jnp.float32),
    )


# ---------------------------------------------------------------------------
# Pure-JAX reference following the PyTorch module exactly (torch layout).
# ---------------------------------------------------------------------------
def _layernorm(x, g, b, eps=1e-5):
    mu = jnp.mean(x, axis=-1, keepdims=True)
    var = jnp.mean((x - mu) ** 2, axis=-1, keepdims=True)
    return (x - mu) * jax.lax.rsqrt(var + eps) * g + b


def _ref_block(x, pt, num_heads):
    B, S, E = x.shape
    hd = E // num_heads
    qkv = x @ pt["qkv_w"].T + pt["qkv_b"]
    qkv = qkv.reshape(B, S, num_heads, 3 * hd).transpose(0, 2, 1, 3)
    q, k, v = jnp.split(qkv, 3, axis=-1)
    logits = jnp.einsum("bhqd,bhkd->bhqk", q, k) / math.sqrt(hd)
    attn = jax.nn.softmax(logits, axis=-1)
    vals = jnp.einsum("bhqk,bhkd->bhqd", attn, v).transpose(0, 2, 1, 3).reshape(B, S, E)
    o = vals @ pt["o_w"].T + pt["o_b"]
    x = _layernorm(x + o, pt["ln1_g"], pt["ln1_b"])
    h = jnp.maximum(x @ pt["l1_w"].T + pt["l1_b"], 0.0)
    ff = h @ pt["l2_w"].T + pt["l2_b"]
    return _layernorm(x + ff, pt["ln2_g"], pt["ln2_b"])


def _ref_transformer(x, torch_layer_params, num_heads):
    for pt in torch_layer_params:
        x = _ref_block(x, pt, num_heads)
    return x


# ---------------------------------------------------------------------------
if __name__ == "__main__":
    # TODO(synk): dropout (p=0.1) is stochastic in torch train mode; implemented
    # as identity (eval-mode forward), mask=None path only.
    num_layers = 2
    batch, seq, embed_dim, num_heads, dim_feedforward = 2, 8, 32, 4, 64

    key = jax.random.PRNGKey(0)
    kx, *klayers = jax.random.split(key, num_layers + 1)
    x = jax.random.normal(kx, (batch, seq, embed_dim), jnp.float32)
    torch_params = [init_encoder_block_params(k, embed_dim, dim_feedforward)
                    for k in klayers]

    ref = _ref_transformer(x, torch_params, num_heads)

    # Primary (bf16 MXU inputs + bf16 activation streaming, f32 softmax/LN).
    out = transformer_encoders(x, torch_params, num_heads,
                               matmul_dtype=jnp.bfloat16)
    out = jax.block_until_ready(out)
    assert out.shape == (batch, seq, embed_dim)
    assert jnp.allclose(out, ref, atol=5e-2, rtol=5e-2), \
        "bf16 kernel mismatch vs JAX reference"

    # Strict numerical check with f32 matmul inputs (same kernel code path,
    # exact softmax reciprocal).
    out_f32 = transformer_encoders(x, torch_params, num_heads,
                                   matmul_dtype=jnp.float32)
    out_f32 = jax.block_until_ready(out_f32)
    assert jnp.allclose(out_f32, ref, atol=5e-3, rtol=5e-3), \
        "f32 kernel mismatch vs JAX reference"

    print("KERNEL_OK")
</pallas_src>

<mosaic_0001>
module attributes {stable_mosaic.version = 11 : i64} {
  func.func @_probe(%arg0: i32, %arg1: memref<8x128xf32, #tpu.memory_space<vmem>>, %arg2: memref<8x128xf32, #tpu.memory_space<vmem>>) attributes {dimension_semantics = [#tpu.dimension_semantics<arbitrary>], iteration_bounds = array<i64: 2>, scalar_prefetch = 0 : i64, scratch_operands = 0 : i64, tpu.core_type = #tpu.core_type<tc>, window_params = [{pipeline_mode = #tpu.pipeline_mode<synchronous>, transform_indices = @transform_0, window_bounds = array<i64: 8, 128>}, {pipeline_mode = #tpu.pipeline_mode<synchronous>, transform_indices = @transform_1, window_bounds = array<i64: 8, 128>}]} {
    %c0 = arith.constant 0 : index
    %c0_0 = arith.constant 0 : index
    %0 = vector.load %arg1[%c0, %c0_0] : memref<8x128xf32, #tpu.memory_space<vmem>>, vector<8x128xf32>
    %cst = arith.constant 1.000000e+00 : f32
    %1 = vector.broadcast %cst : f32 to vector<8x128xf32>
    %2 = arith.addf %0, %1 : vector<8x128xf32>
    %c0_1 = arith.constant 0 : index
    %c0_2 = arith.constant 0 : index
    %3 = vector.load %arg2[%c0_1, %c0_2] : memref<8x128xf32, #tpu.memory_space<vmem>>, vector<8x128xf32>
    tpu.vector_store %arg2[%c0_1, %c0_2], %2 {strides = array<i32>} : memref<8x128xf32, #tpu.memory_space<vmem>>, vector<8x128xf32>,
    return
  }
  func.func @transform_0(%arg0: i32) -> (i32, i32) {
    %c0_i32 = arith.constant 0 : i32
    %c0_i32_0 = arith.constant 0 : i32
    %c0_i32_1 = arith.constant 0 : i32
    return %c0_i32, %c0_i32_0 : i32, i32
  }
  func.func @transform_1(%arg0: i32) -> (i32, i32) {
    %c0_i32 = arith.constant 0 : i32
    %c0_i32_0 = arith.constant 0 : i32
    %c0_i32_1 = arith.constant 0 : i32
    return %c0_i32, %c0_i32_0 : i32, i32
  }
}

module attributes {stable_mosaic.version = 11 : i64} {
  func.func @encoder_block_kernel(%arg0: i32, %arg1: memref<8x32xbf16, #tpu.memory_space<vmem>>, %arg2: memref<32x96xbf16, #tpu.memory_space<vmem>>, %arg3: memref<1x96xf32, #tpu.memory_space<vmem>>, %arg4: memref<32x32xbf16, #tpu.memory_space<vmem>>, %arg5: memref<1x32xf32, #tpu.memory_space<vmem>>, %arg6: memref<1x32xf32, #tpu.memory_space<vmem>>, %arg7: memref<1x32xf32, #tpu.memory_space<vmem>>, %arg8: memref<32x64xbf16, #tpu.memory_space<vmem>>, %arg9: memref<1x64xf32, #tpu.memory_space<vmem>>, %arg10: memref<64x32xbf16, #tpu.memory_space<vmem>>, %arg11: memref<1x32xf32, #tpu.memory_space<vmem>>, %arg12: memref<1x32xf32, #tpu.memory_space<vmem>>, %arg13: memref<1x32xf32, #tpu.memory_space<vmem>>, %arg14: memref<8x32xbf16, #tpu.memory_space<vmem>>) attributes {dimension_semantics = [#tpu.dimension_semantics<parallel>], iteration_bounds = array<i64: 2>, scalar_prefetch = 0 : i64, scratch_operands = 0 : i64, tpu.core_type = #tpu.core_type<tc>, window_params = [{transform_indices = @transform_0, window_bounds = array<i64: 8, 32>}, {pipeline_mode = #tpu.pipeline_mode<synchronous>, transform_indices = @transform_1, window_bounds = array<i64: 32, 96>}, {pipeline_mode = #tpu.pipeline_mode<synchronous>, transform_indices = @transform_2, window_bounds = array<i64: 1, 96>}, {pipeline_mode = #tpu.pipeline_mode<synchronous>, transform_indices = @transform_3, window_bounds = array<i64: 32, 32>}, {pipeline_mode = #tpu.pipeline_mode<synchronous>, transform_indices = @transform_4, window_bounds = array<i64: 1, 32>}, {pipeline_mode = #tpu.pipeline_mode<synchronous>, transform_indices = @transform_5, window_bounds = array<i64: 1, 32>}, {pipeline_mode = #tpu.pipeline_mode<synchronous>, transform_indices = @transform_6, window_bounds = array<i64: 1, 32>}, {pipeline_mode = #tpu.pipeline_mode<synchronous>, transform_indices = @transform_7, window_bounds = array<i64: 32, 64>}, {pipeline_mode = #tpu.pipeline_mode<synchronous>, transform_indices = @transform_8, window_bounds = array<i64: 1, 64>}, {pipeline_mode = #tpu.pipeline_mode<synchronous>, transform_indices = @transform_9, window_bounds = array<i64: 64, 32>}, {pipeline_mode = #tpu.pipeline_mode<synchronous>, transform_indices = @transform_10, window_bounds = array<i64: 1, 32>}, {pipeline_mode = #tpu.pipeline_mode<synchronous>, transform_indices = @transform_11, window_bounds = array<i64: 1, 32>}, {pipeline_mode = #tpu.pipeline_mode<synchronous>, transform_indices = @transform_12, window_bounds = array<i64: 1, 32>}, {transform_indices = @transform_13, window_bounds = array<i64: 8, 32>}]} {
    %c0 = arith.constant 0 : index
    %c0_0 = arith.constant 0 : index
    %0 = vector.load %arg1[%c0, %c0_0] : memref<8x32xbf16, #tpu.memory_space<vmem>>, vector<8x32xbf16>
    %1 = arith.extf %0 : vector<8x32xbf16> to vector<8x32xf32>
    %c0_1 = arith.constant 0 : index
    %c0_2 = arith.constant 0 : index
    %2 = vector.load %arg2[%c0_1, %c0_2] : memref<32x96xbf16, #tpu.memory_space<vmem>>, vector<32x96xbf16>
    %cst = arith.constant dense<0.000000e+00> : vector<8x96xf32>
    %3 = tpu.matmul %0, %2, %cst {dimension_numbers = #tpu.dot_dimension_numbers<[1], [0], [0], [1], [0, 0, 1, 1], [], []>} : vector<8x32xbf16>, vector<32x96xbf16>, vector<8x96xf32> -> vector<8x96xf32>
    %c0_3 = arith.constant 0 : index
    %c0_4 = arith.constant 0 : index
    %4 = vector.load %arg3[%c0_3, %c0_4] : memref<1x96xf32, #tpu.memory_space<vmem>>, vector<1x96xf32>
    %5 = vector.broadcast %4 : vector<1x96xf32> to vector<8x96xf32>
    %6 = arith.addf %3, %5 : vector<8x96xf32>
    %7 = arith.truncf %6 : vector<8x96xf32> to vector<8x96xbf16>
    %8 = vector.extract_strided_slice %7 {offsets = [0, 0], sizes = [8, 32], strides = [1, 1]} : vector<8x96xbf16> to vector<8x32xbf16>
    %9 = vector.shape_cast %8 : vector<8x32xbf16> to vector<1x8x4x8xbf16>
    %10 = tpu.transpose %9, [0, 2, 1, 3] : vector<1x8x4x8xbf16> -> vector<1x4x8x8xbf16>
    %11 = vector.shape_cast %10 : vector<1x4x8x8xbf16> to vector<4x8x8xbf16>
    %12 = vector.extract_strided_slice %7 {offsets = [0, 32], sizes = [8, 32], strides = [1, 1]} : vector<8x96xbf16> to vector<8x32xbf16>
    %13 = vector.shape_cast %12 : vector<8x32xbf16> to vector<1x8x4x8xbf16>
    %14 = tpu.transpose %13, [0, 2, 1, 3] : vector<1x8x4x8xbf16> -> vector<1x4x8x8xbf16>
    %15 = vector.shape_cast %14 : vector<1x4x8x8xbf16> to vector<4x8x8xbf16>
    %16 = vector.extract_strided_slice %7 {offsets = [0, 64], sizes = [8, 32], strides = [1, 1]} : vector<8x96xbf16> to vector<8x32xbf16>
    %17 = vector.shape_cast %16 : vector<8x32xbf16> to vector<1x8x4x8xbf16>
    %18 = tpu.transpose %17, [0, 2, 1, 3] : vector<1x8x4x8xbf16> -> vector<1x4x8x8xbf16>
    %19 = vector.shape_cast %18 : vector<1x4x8x8xbf16> to vector<4x8x8xbf16>
    "tpu.trace_start"() <{level = 10 : i32, message = "bqd,bkd->bqk"}> : () -> ()
    %cst_5 = arith.constant dense<0.000000e+00> : vector<4x8x8xf32>
    %20 = tpu.matmul %11, %15, %cst_5 {dimension_numbers = #tpu.dot_dimension_numbers<[2], [2], [1], [1], [0, 0, 0, 1, 1, 1], [0], [0]>} : vector<4x8x8xbf16>, vector<4x8x8xbf16>, vector<4x8x8xf32> -> vector<4x8x8xf32>
    "tpu.trace_stop"() : () -> ()
    %cst_6 = arith.constant dense<0xFF800000> : vector<4x8xf32>
    %21 = vector.multi_reduction <maximumf>, %20, %cst_6 [2] : vector<4x8x8xf32> to vector<4x8xf32>
    %22 = vector.shape_cast %21 : vector<4x8xf32> to vector<4x8x1xf32>
    %23 = vector.broadcast %22 : vector<4x8x1xf32> to vector<4x8x8xf32>
    %24 = arith.subf %20, %23 : vector<4x8x8xf32>
    %25 = math.exp %24 : vector<4x8x8xf32>
    %cst_7 = arith.constant dense<0.000000e+00> : vector<4x8xf32>
    %26 = vector.multi_reduction <add>, %25, %cst_7 [2] : vector<4x8x8xf32> to vector<4x8xf32>
    %27 = vector.shape_cast %26 : vector<4x8xf32> to vector<4x8x1xf32>
    %28 = tpu.reciprocal %27 {approx = true} : vector<4x8x1xf32> -> vector<4x8x1xf32>
    %29 = vector.broadcast %28 : vector<4x8x1xf32> to vector<4x8x8xf32>
    %30 = arith.mulf %25, %29 : vector<4x8x8xf32>
    %31 = arith.truncf %30 : vector<4x8x8xf32> to vector<4x8x8xbf16>
    "tpu.trace_start"() <{level = 10 : i32, message = "bqk,bkd->bqd"}> : () -> ()
    %cst_8 = arith.constant dense<0.000000e+00> : vector<4x8x8xf32>
    %32 = tpu.matmul %31, %19, %cst_8 {dimension_numbers = #tpu.dot_dimension_numbers<[2], [1], [1], [2], [0, 0, 0, 1, 1, 2], [0], [0]>} : vector<4x8x8xbf16>, vector<4x8x8xbf16>, vector<4x8x8xf32> -> vector<4x8x8xf32>
    "tpu.trace_stop"() : () -> ()
    %33 = vector.shape_cast %32 : vector<4x8x8xf32> to vector<1x4x8x8xf32>
    %34 = tpu.transpose %33, [0, 2, 1, 3] : vector<1x4x8x8xf32> -> vector<1x8x4x8xf32>
    %35 = vector.shape_cast %34 : vector<1x8x4x8xf32> to vector<8x32xf32>
    %c0_9 = arith.constant 0 : index
    %c0_10 = arith.constant 0 : index
    %36 = vector.load %arg4[%c0_9, %c0_10] : memref<32x32xbf16, #tpu.memory_space<vmem>>, vector<32x32xbf16>
    %37 = arith.truncf %35 : vector<8x32xf32> to vector<8x32xbf16>
    %cst_11 = arith.constant dense<0.000000e+00> : vector<8x32xf32>
    %38 = tpu.matmul %37, %36, %cst_11 {dimension_numbers = #tpu.dot_dimension_numbers<[1], [0], [0], [1], [0, 0, 1, 1], [], []>} : vector<8x32xbf16>, vector<32x32xbf16>, vector<8x32xf32> -> vector<8x32xf32>
    %c0_12 = arith.constant 0 : index
    %c0_13 = arith.constant 0 : index
    %39 = vector.load %arg5[%c0_12, %c0_13] : memref<1x32xf32, #tpu.memory_space<vmem>>, vector<1x32xf32>
    %40 = vector.broadcast %39 : vector<1x32xf32> to vector<8x32xf32>
    %41 = arith.addf %38, %40 : vector<8x32xf32>
    %42 = arith.addf %1, %41 : vector<8x32xf32>
    %cst_14 = arith.constant dense<0.000000e+00> : vector<8xf32>
    %43 = vector.multi_reduction <add>, %42, %cst_14 [1] : vector<8x32xf32> to vector<8xf32>
    %44 = vector.shape_cast %43 : vector<8xf32> to vector<8x1xf32>
    %cst_15 = arith.constant 3.200000e+01 : f32
    %45 = vector.broadcast %cst_15 : f32 to vector<8x1xf32>
    %46 = arith.divf %44, %45 : vector<8x1xf32>
    %47 = vector.broadcast %46 : vector<8x1xf32> to vector<8x32xf32>
    %48 = arith.subf %42, %47 : vector<8x32xf32>
    %49 = arith.mulf %48, %48 : vector<8x32xf32>
    %cst_16 = arith.constant dense<0.000000e+00> : vector<8xf32>
    %50 = vector.multi_reduction <add>, %49, %cst_16 [1] : vector<8x32xf32> to vector<8xf32>
    %51 = vector.shape_cast %50 : vector<8xf32> to vector<8x1xf32>
    %cst_17 = arith.constant 3.200000e+01 : f32
    %52 = vector.broadcast %cst_17 : f32 to vector<8x1xf32>
    %53 = arith.divf %51, %52 : vector<8x1xf32>
    %cst_18 = arith.constant 9.99999974E-6 : f32
    %54 = vector.broadcast %cst_18 : f32 to vector<8x1xf32>
    %55 = arith.addf %53, %54 : vector<8x1xf32>
    %56 = math.rsqrt %55 : vector<8x1xf32>
    %57 = vector.broadcast %56 : vector<8x1xf32> to vector<8x32xf32>
    %58 = arith.mulf %48, %57 : vector<8x32xf32>
    %c0_19 = arith.constant 0 : index
    %c0_20 = arith.constant 0 : index
    %59 = vector.load %arg6[%c0_19, %c0_20] : memref<1x32xf32, #tpu.memory_space<vmem>>, vector<1x32xf32>
    %60 = vector.broadcast %59 : vector<1x32xf32> to vector<8x32xf32>
    %61 = arith.mulf %58, %60 : vector<8x32xf32>
    %c0_21 = arith.constant 0 : index
    %c0_22 = arith.constant 0 : index
    %62 = vector.load %arg7[%c0_21, %c0_22] : memref<1x32xf32, #tpu.memory_space<vmem>>, vector<1x32xf32>
    %63 = vector.broadcast %62 : vector<1x32xf32> to vector<8x32xf32>
    %64 = arith.addf %61, %63 : vector<8x32xf32>
    %c0_23 = arith.constant 0 : index
    %c0_24 = arith.constant 0 : index
    %65 = vector.load %arg8[%c0_23, %c0_24] : memref<32x64xbf16, #tpu.memory_space<vmem>>, vector<32x64xbf16>
    %66 = arith.truncf %64 : vector<8x32xf32> to vector<8x32xbf16>
    %cst_25 = arith.constant dense<0.000000e+00> : vector<8x64xf32>
    %67 = tpu.matmul %66, %65, %cst_25 {dimension_numbers = #tpu.dot_dimension_numbers<[1], [0], [0], [1], [0, 0, 1, 1], [], []>} : vector<8x32xbf16>, vector<32x64xbf16>, vector<8x64xf32> -> vector<8x64xf32>
    %c0_26 = arith.constant 0 : index
    %c0_27 = arith.constant 0 : index
    %68 = vector.load %arg9[%c0_26, %c0_27] : memref<1x64xf32, #tpu.memory_space<vmem>>, vector<1x64xf32>
    %69 = vector.broadcast %68 : vector<1x64xf32> to vector<8x64xf32>
    %70 = arith.addf %67, %69 : vector<8x64xf32>
    %cst_28 = arith.constant 0.000000e+00 : f32
    %71 = vector.broadcast %cst_28 : f32 to vector<8x64xf32>
    %72 = arith.maximumf %70, %71 : vector<8x64xf32>
    %73 = arith.truncf %72 : vector<8x64xf32> to vector<8x64xbf16>
    %c0_29 = arith.constant 0 : index
    %c0_30 = arith.constant 0 : index
    %74 = vector.load %arg10[%c0_29, %c0_30] : memref<64x32xbf16, #tpu.memory_space<vmem>>, vector<64x32xbf16>
    %cst_31 = arith.constant dense<0.000000e+00> : vector<8x32xf32>
    %75 = tpu.matmul %73, %74, %cst_31 {dimension_numbers = #tpu.dot_dimension_numbers<[1], [0], [0], [1], [0, 0, 1, 1], [], []>} : vector<8x64xbf16>, vector<64x32xbf16>, vector<8x32xf32> -> vector<8x32xf32>
    %c0_32 = arith.constant 0 : index
    %c0_33 = arith.constant 0 : index
    %76 = vector.load %arg11[%c0_32, %c0_33] : memref<1x32xf32, #tpu.memory_space<vmem>>, vector<1x32xf32>
    %77 = vector.broadcast %76 : vector<1x32xf32> to vector<8x32xf32>
    %78 = arith.addf %75, %77 : vector<8x32xf32>
    %79 = arith.addf %64, %78 : vector<8x32xf32>
    %cst_34 = arith.constant dense<0.000000e+00> : vector<8xf32>
    %80 = vector.multi_reduction <add>, %79, %cst_34 [1] : vector<8x32xf32> to vector<8xf32>
    %81 = vector.shape_cast %80 : vector<8xf32> to vector<8x1xf32>
    %cst_35 = arith.constant 3.200000e+01 : f32
    %82 = vector.broadcast %cst_35 : f32 to vector<8x1xf32>
    %83 = arith.divf %81, %82 : vector<8x1xf32>
    %84 = vector.broadcast %83 : vector<8x1xf32> to vector<8x32xf32>
    %85 = arith.subf %79, %84 : vector<8x32xf32>
    %86 = arith.mulf %85, %85 : vector<8x32xf32>
    %cst_36 = arith.constant dense<0.000000e+00> : vector<8xf32>
    %87 = vector.multi_reduction <add>, %86, %cst_36 [1] : vector<8x32xf32> to vector<8xf32>
    %88 = vector.shape_cast %87 : vector<8xf32> to vector<8x1xf32>
    %cst_37 = arith.constant 3.200000e+01 : f32
    %89 = vector.broadcast %cst_37 : f32 to vector<8x1xf32>
    %90 = arith.divf %88, %89 : vector<8x1xf32>
    %cst_38 = arith.constant 9.99999974E-6 : f32
    %91 = vector.broadcast %cst_38 : f32 to vector<8x1xf32>
    %92 = arith.addf %90, %91 : vector<8x1xf32>
    %93 = math.rsqrt %92 : vector<8x1xf32>
    %94 = vector.broadcast %93 : vector<8x1xf32> to vector<8x32xf32>
    %95 = arith.mulf %85, %94 : vector<8x32xf32>
    %c0_39 = arith.constant 0 : index
    %c0_40 = arith.constant 0 : index
    %96 = vector.load %arg12[%c0_39, %c0_40] : memref<1x32xf32, #tpu.memory_space<vmem>>, vector<1x32xf32>
    %97 = vector.broadcast %96 : vector<1x32xf32> to vector<8x32xf32>
    %98 = arith.mulf %95, %97 : vector<8x32xf32>
    %c0_41 = arith.constant 0 : index
    %c0_42 = arith.constant 0 : index
    %99 = vector.load %arg13[%c0_41, %c0_42] : memref<1x32xf32, #tpu.memory_space<vmem>>, vector<1x32xf32>
    %100 = vector.broadcast %99 : vector<1x32xf32> to vector<8x32xf32>
    %101 = arith.addf %98, %100 : vector<8x32xf32>
    %102 = arith.truncf %101 : vector<8x32xf32> to vector<8x32xbf16>
    %c0_43 = arith.constant 0 : index
    %c0_44 = arith.constant 0 : index
    %103 = vector.load %arg14[%c0_43, %c0_44] : memref<8x32xbf16, #tpu.memory_space<vmem>>, vector<8x32xbf16>
    tpu.vector_store %arg14[%c0_43, %c0_44], %102 {strides = array<i32>} : memref<8x32xbf16, #tpu.memory_space<vmem>>, vector<8x32xbf16>,
    return
  }
  func.func @transform_0(%arg0: i32) -> (i32, i32) {
    %c0_i32 = arith.constant 0 : i32
    %c0_i32_0 = arith.constant 0 : i32
    return %arg0, %c0_i32 : i32, i32
  }
  func.func @transform_1(%arg0: i32) -> (i32, i32) {
    %c0_i32 = arith.constant 0 : i32
    %c0_i32_0 = arith.constant 0 : i32
    %c0_i32_1 = arith.constant 0 : i32
    return %c0_i32, %c0_i32_0 : i32, i32
  }
  func.func @transform_2(%arg0: i32) -> (i32, i32) {
    %c0_i32 = arith.constant 0 : i32
    %c0_i32_0 = arith.constant 0 : i32
    %c0_i32_1 = arith.constant 0 : i32
    return %c0_i32, %c0_i32_0 : i32, i32
  }
  func.func @transform_3(%arg0: i32) -> (i32, i32) {
    %c0_i32 = arith.constant 0 : i32
    %c0_i32_0 = arith.constant 0 : i32
    %c0_i32_1 = arith.constant 0 : i32
    return %c0_i32, %c0_i32_0 : i32, i32
  }
  func.func @transform_4(%arg0: i32) -> (i32, i32) {
    %c0_i32 = arith.constant 0 : i32
    %c0_i32_0 = arith.constant 0 : i32
    %c0_i32_1 = arith.constant 0 : i32
    return %c0_i32, %c0_i32_0 : i32, i32
  }
  func.func @transform_5(%arg0: i32) -> (i32, i32) {
    %c0_i32 = arith.constant 0 : i32
    %c0_i32_0 = arith.constant 0 : i32
    %c0_i32_1 = arith.constant 0 : i32
    return %c0_i32, %c0_i32_0 : i32, i32
  }
  func.func @transform_6(%arg0: i32) -> (i32, i32) {
    %c0_i32 = arith.constant 0 : i32
    %c0_i32_0 = arith.constant 0 : i32
    %c0_i32_1 = arith.constant 0 : i32
    return %c0_i32, %c0_i32_0 : i32, i32
  }
  func.func @transform_7(%arg0: i32) -> (i32, i32) {
    %c0_i32 = arith.constant 0 : i32
    %c0_i32_0 = arith.constant 0 : i32
    %c0_i32_1 = arith.constant 0 : i32
    return %c0_i32, %c0_i32_0 : i32, i32
  }
  func.func @transform_8(%arg0: i32) -> (i32, i32) {
    %c0_i32 = arith.constant 0 : i32
    %c0_i32_0 = arith.constant 0 : i32
    %c0_i32_1 = arith.constant 0 : i32
    return %c0_i32, %c0_i32_0 : i32, i32
  }
  func.func @transform_9(%arg0: i32) -> (i32, i32) {
    %c0_i32 = arith.constant 0 : i32
    %c0_i32_0 = arith.constant 0 : i32
    %c0_i32_1 = arith.constant 0 : i32
    return %c0_i32, %c0_i32_0 : i32, i32
  }
  func.func @transform_10(%arg0: i32) -> (i32, i32) {
    %c0_i32 = arith.constant 0 : i32
    %c0_i32_0 = arith.constant 0 : i32
    %c0_i32_1 = arith.constant 0 : i32
    return %c0_i32, %c0_i32_0 : i32, i32
  }
  func.func @transform_11(%arg0: i32) -> (i32, i32) {
    %c0_i32 = arith.constant 0 : i32
    %c0_i32_0 = arith.constant 0 : i32
    %c0_i32_1 = arith.constant 0 : i32
    return %c0_i32, %c0_i32_0 : i32, i32
  }
  func.func @transform_12(%arg0: i32) -> (i32, i32) {
    %c0_i32 = arith.constant 0 : i32
    %c0_i32_0 = arith.constant 0 : i32
    %c0_i32_1 = arith.constant 0 : i32
    return %c0_i32, %c0_i32_0 : i32, i32
  }
  func.func @transform_13(%arg0: i32) -> (i32, i32) {
    %c0_i32 = arith.constant 0 : i32
    %c0_i32_0 = arith.constant 0 : i32
    return %arg0, %c0_i32 : i32, i32
  }
}

</mosaic_0001>

<bundles_post_ra>
// kernel: tpu_custom_call.1
= control target key start
LH: loop header
LB: loop body
LE: loop exit
PB: predicated region body
PF: predicated region fallthrough
CT: control target
= control target key end

     0   :  { %6 = vsyncpa [#allocation3], 0  ;;  %s305_s0 = inlined_call_operand.hbm [shape: f32[8,128], index: 0, kind: input, shape index: {}]   ;;  %s306_s1 = inlined_call_operand.hbm [shape: f32[8,128], index: 1, kind: output, shape index: {}]  }
   0x1   :  { %7 = vsyncpa [#allocation4], 0  ;;  %s258_s6 = smov 0  }
   0x2 LB: > { %s145_s7 = sadd.s32 4294967295, %s244_s6   ;;  %p146_p0 = scmp.ge.s32.totalorder %s244_s6, 1  ;;  %s244_s6 = sphi %s258_s6, %s13_s6  }
   0x3   : > { %p60_p1 = scmp.lt.s32.totalorder %s244_s6, 3  ;;  %p270_p3 = scmp.eq.s32.totalorder %s145_s7, 0 }
   0x4   : > { %s246_s10 = smov [#allocation2]  }
   0x5   : > { %p266_p2 = pnand %p146_p0, %p60_p1  ;;  %s73_s11 = sshll.u32 %s246_s10, 4  ;;  %s74_s11 = int_to_ptr.vmem [resolvable:$true] %s73_s11 }
   0x6   : > { %s191_s12 = scalar_lea.vmem %s74_s11, 128  ;;  %p199_p10 = scmp.lt.s32.totalorder %s74_s11, %s74_s11 }
   0x7   : > { %p162_p4 = pneg %p266_p2  ;;  %p192_p7 = scmp.ne.s32.totalorder %s74_s11, %s191_s12 }
   0x8   : > { %p200_p11 = scmp.lt.s32.totalorder %s191_s12, %s191_s12 }
   0x9   : > { %p163_p5 = pnand %p270_p3, %p162_p4 }
   0xa   : > { %p201_p12 = por %p200_p11, %p199_p10 }
   0xb   : > { %p182_p6 = pneg %p163_p5 }
   0xd   : > { %p194_p8 = pnand %p192_p7, %p182_p6 }
   0xf   : > { %p195_p9 = pneg %p194_p8 }
  0x11   : > { %p202_p13 = pnand %p201_p12, %p195_p9 }
  0x13   : > { %205 = shalt.err (!%p202_p13)
}
  0x14   : > { %165 = dma.hbm_to_vmem [thread:$0]  (!%p163_p5), %s305_s0, 128, %s74_s11, [#allocation3]  }
  0x15   : > { %86 = sbr.rel (%p266_p2) target bundleno = 42 (0x2a), region = 24 }
  0x1a   : > { %235 = dma.done.wait (%p270_p3), [#allocation3], 128  }
  0x1b   : > { %237 = vsyncadd (%p270_p3), [#allocation3], 4294967168  ;;  %s247_s15 = smov [#allocation5]   ;;  %v96_v0 = vld [vmem:[#allocation2] sm:$0xff]  ;;  %p287_p0 = scmp.eq.s32.totalorder %s145_s7, 1 }
  0x1c   : > { %s106_s16 = sshll.u32 %s247_s15, 4  ;;  %v97_v1 = vadd.f32 1.0, %v96_v0  ;;  %s107_s16 = int_to_ptr.vmem [resolvable:$true] %s106_s16 }
  0x1d   : > { %s206_s18 = scalar_lea.vmem %s107_s16, 128  ;;  %p213_p5 = scmp.lt.s32.totalorder %s107_s16, %s107_s16 }
  0x1e   : > { %98 = vst [vmem:[#allocation5] sm:$0xff] %v97_v1  ;;  %p207_p1 = scmp.ne.s32.totalorder %s107_s16, %s206_s18  ;;  %p214_p6 = scmp.lt.s32.totalorder %s206_s18, %s206_s18 }
  0x20   : > { %p208_p2 = pnand %p207_p1, %p287_p0  ;;  %p215_p7 = por %p214_p6, %p213_p5 }
  0x22   : > { %p209_p4 = pneg %p208_p2 }
  0x24   : > { %p216_p3 = pnand %p215_p7, %p209_p4 }
  0x26   : > { %219 = shalt.err (!%p216_p3)
}
  0x27   : > { %159 = dma.vmem_to_hbm [thread:$0]  (%p287_p0), %s107_s16, 128, %s306_s1, [#allocation4]  }
  0x28   : > { %239 = dma.done.wait (%p287_p0), [#allocation4], 128  }
  0x29   : > { %241 = vsyncadd (%p287_p0), [#allocation4], 4294967168 }
  0x2a PF: > { %s13_s6 = sadd.s32 1, %s244_s6  }
  0x2b   : > { %p10_p8 = scmp.ge.s32.totalorder %s13_s6, 4  }
  0x2d   :  { %12 = sbr.rel (!%p10_p8) target bundleno = 2 (0x2), region = 53 }
  0x32   :  { %119 = vsyncpa [#allocation3], 1 }
  0x33   :  { %121 = vsyncpa [#allocation3 + $0x1], 1 }
  0x34   :  { %122 = vsyncpa [#allocation4], 1 }
  0x35   :  { %124 = vsyncpa [#allocation4 + $0x1], 1 }

// kernel: _forward.2
= control target key start
LH: loop header
LB: loop body
LE: loop exit
PB: predicated region body
PF: predicated region fallthrough
CT: control target
= control target key end

     0   :  { %s2219_s25 = smov 0   ;;  %s2514_s0 = inlined_call_operand.vmem [shape: bf16[16,32], index: 0, kind: input, shape index: {}]   ;;  %s2515_s1 = inlined_call_operand.vmem [shape: bf16[32,96], index: 1, kind: input, shape index: {}]   ;;  %s2516_s2 = inlined_call_operand.vmem [shape: f32[1,96], index: 2, kind: input, shape index: {}]   ;;  %s2517_s3 = inlined_call_operand.vmem [shape: bf16[32,32], index: 3, kind: input, shape index: {}]   ;;  %s2518_s4 = inlined_call_operand.vmem [shape: f32[1,32], index: 4, kind: input, shape index: {}]   ;;  %s2519_s5 = inlined_call_operand.vmem [shape: f32[1,32], index: 5, kind: input, shape index: {}]   ;;  %s2520_s6 = inlined_call_operand.vmem [shape: f32[1,32], index: 6, kind: input, shape index: {}]   ;;  %s2521_s7 = inlined_call_operand.vmem [shape: bf16[32,64], index: 7, kind: input, shape index: {}]   ;;  %s2522_s8 = inlined_call_operand.vmem [shape: f32[1,64], index: 8, kind: input, shape index: {}]   ;;  %s2523_s9 = inlined_call_operand.vmem [shape: bf16[64,32], index: 9, kind: input, shape index: {}]   ;;  %s2524_s10 = inlined_call_operand.vmem [shape: f32[1,32], index: 10, kind: input, shape index: {}]   ;;  %s2525_s11 = inlined_call_operand.vmem [shape: f32[1,32], index: 11, kind: input, shape index: {}]   ;;  %s2526_s12 = inlined_call_operand.vmem [shape: f32[1,32], index: 12, kind: input, shape index: {}]   ;;  %s2527_s13 = inlined_call_operand.vmem [shape: bf16[16,32], index: 13, kind: output, shape index: {}]  }
   0x1 LB: > { %s1922_s26 = sadd.s32 4294967295, %s2134_s25   ;;  %p1926_p0 = scmp.ge.s32.totalorder %s2134_s25, 1  ;;  %s2134_s25 = sphi %s2219_s25, %s23_s25  }
   0x2   : > { %p386_p1 = scmp.lt.s32.totalorder %s2134_s25, 3 }
   0x4   : > { %p387_p2 = pnand %p1926_p0, %p386_p1 }
   0x5   : > { %p428_p3 = scmp.lt.s32.totalorder (!%p387_p2), %s1922_s26, 1  ;;  %s2138_s20 = smov (!%p387_p2), 104  }
   0x6   : > { %390 = sbr.rel (%p387_p2) target bundleno = 2591 (0xa1f), region = 72  ;;  %s2139_s21 = smov (!%p387_p2), 120  }
   0x7   : > { %s2140_s22 = smov (!%p387_p2), 96   ;;  %s2141_s23 = smov (!%p387_p2), 112  }
   0x8   : > { %s2145_s24 = smov (!%p387_p2), 64   ;;  %s2146_s15 = smov (!%p387_p2), 16  }
   0x9   : > { %s2147_s16 = smov (!%p387_p2), 8  }
   0xb   : > { %v2098_v0 = vld [vmem:[%s2515_s1 + $0x8] sm:$0xff]   ;;  %v2136_v1 = vmov 0.0   ;;  %v2099_v2 = vld [vmem:[%s2515_s1] sm:$0xff]   ;;  %vm2137_vm0 = vmmov 0   ;;  %s2529_s26 = smov (!%p428_p3, %s1922_s26), 1  ;;  %vm462_vm1 = vcmask 261120   ;;  %v517_v16 = vlaneseq }
   0xc   : > { %1993 = vmatprep.subr.bf16.mxu0 %v2136_v1  ;;  %2001 = vmatprep.subr.bf16.mxu1 %v2136_v1  ;;  %s1927_s14 = sshll.u32 %s2529_s26, 2  ;;  %v1929_v4 = vld [vmem:[%s2516_s2] ss:$0 sm:$0xff]  ;;  %v2142_v14 = vmov 1983009808   ;;  %v2144_v38 = vmov 0  }
   0xd   : > { %1994 = vmatpush3.bf16.msra.mxu0 %v2098_v0  ;;  %1997 = vmatprep.mubr.msk.bf16.mxu0 %vm2137_vm0, %v2136_v1  ;;  %s431_s17 = scalar_lea.vmem %s2514_s0, %s1927_s14  ;;  %v515_v15 = vunpack.c.l.s4 %v2142_v14  ;;  %v518_v18 = vshrl.u32 %v517_v16, 7  ;;  %v2143_v19 = vmov 1934713408   ;;  %vm1015_vm2 = vcmask 64512   ;;  %s435_s18 = scalar_lea.vmem %s2527_s13, %s1927_s14 }
   0xe   : > { %1995 = vmatprep.subr.bf16.mxu0 %v2136_v1  ;;  %2003 = vmatprep.mubr.msk.bf16.mxu1 %vm2137_vm0, %v2136_v1  ;;  %v2249_v3 = vld [vmem:[%s431_s17] sm:$0xf]  ;;  %v532_v20 = vunpack.c.l.s4 %v2143_v19  ;;  %vm1251_vm3 = vcmask 1043456   ;;  %s2148_s17 = smov 24   ;;  %vm1582_vm4 = vcmask 130048   ;;  %vm1584_vm5 = vcmask 195584  }
   0xf   : > { %v516_v17 = vunpack.c.0.s8 %v515_v15  ;;  %vm1792_vm6 = vcmask 523264   ;;  %vm1867_vm7 = vcmask 257024  }
  0x10   : > { %v533_v23 = vunpack.c.0.s8 %v532_v20 }
  0x11   : > { %1996 = vmatpush3.bf16.msra.mxu0 %v2099_v2  ;;  %v2273_v21 = vsub.s32 %v516_v17, %v518_v18 }
  0x12   : > { %2007 = vmatprep.subr.bf16.mxu0 %v2136_v1  ;;  %v2283_v27 = vsub.s32 %v533_v23, %v518_v18 }
  0x14   : > { %1998 = vmatmul.mubr.msk.bf16.vlgmr.msra.gmra.mxu0 %vm462_vm1, %v2249_v3 }
  0x15   : > { %2009 = vmatprep.mubr.msk.bf16.mxu0 %vm2137_vm0, %v2136_v1 }
  0xd4   : > { %v500_v5 = vpop.f32.mrf.mxu0 }
  0xd5   : > { %v501_v6 = vadd.f32 %v1929_v4, %v500_v5 }
  0xd6   : > { %v1999_v7 = vpop.f32.mrf.mxu0 }
  0xd7   : > { %v2258_v8 = vpack.c.bf16 %v501_v6, %v501_v6 }
  0xd8   : > { %v503_v9 = vpop.f32.mrf.mxu0 }
  0xd9   : > { %512 = vrot.lane.b32.xlu1 %v2258_v8, %s2138_s20  ;;  %508 = vrot.lane.b32.xlu0 %v2258_v8, %s2139_s21  ;;  %v520_v26 = vrot.slane %v2258_v8, %v2273_v21 }
  0xda   : > { %v2000_v10 = vpop.f32.mrf.mxu0 }
  0xdd   : > { %675 = vrot.lane.b32.xlu1 %v2258_v8, %s2140_s22  ;;  %510 = vrot.lane.b32.xlu0 %v2258_v8, %s2141_s23 }
 0x14b   : > { %v2264_v11 = vpop.permute.xlu0 %508  ;;  %v2267_v12 = vpop.permute.xlu1 %512 }
 0x14c   : > { %677 = vrot.lane.b32.xlu0 %v2264_v11, %s2140_s22  ;;  %v562_v22 = vrot.slane %v2267_v12, %v2273_v21  ;;  %v554_v24 = vrot.slane %v2264_v11, %v2273_v21 }
 0x14e   : > { %v563_v28 = vcombine.low %v554_v24, %v562_v22  ;;  %v564_v31 = vcombine.high %v554_v24, %v562_v22 }
 0x14f   : > { %v2269_v13 = vpop.permute.xlu0 %510  ;;  %v676_v37 = vpop.permute.xlu1 %675 }
 0x150   : > { %681 = vrot.lane.b32.xlu0 %v2267_v12, %s2140_s22  ;;  %679 = vrot.lane.b32.xlu1 %v2269_v13, %s2140_s22  ;;  %v528_v25 = vrot.slane %v2269_v13, %v2273_v21  ;;  %v2286_v32 = vrot.slane %v563_v28, %v2283_v27  ;;  %v2295_v35 = vrot.slane %v564_v31, %v2283_v27 }
 0x151   : > { %v690_v44 = vrot.slane %v676_v37, %v2273_v21 }
 0x152   : > { %v529_v29 = vcombine.low %v520_v26, %v528_v25  ;;  %v530_v30 = vcombine.high %v520_v26, %v528_v25  ;;  %v579_v39 = vcombine.high %v2286_v32, %v2144_v38  ;;  %v580_v42 = vcombine.high %v2295_v35, %v2144_v38 }
 0x153   : > { %v586_v43 = vshrl.u32 %v2286_v32, 16  ;;  %v602_v47 = vshrl.u32 %v2295_v35, 16 }
 0x154   : > { %v2289_v33 = vrot.slane %v529_v29, %v2283_v27  ;;  %v2292_v34 = vrot.slane %v530_v30, %v2283_v27  ;;  %v594_v52 = vshrl.u32 %v579_v39, 16  ;;  %v610_v56 = vshrl.u32 %v580_v42, 16 }
 0x156   : > { %v545_v40 = vcombine.high %v2289_v33, %v2144_v38  ;;  %v546_v41 = vcombine.high %v2292_v34, %v2144_v38  ;;  %v585_v45 = vshrl.u32 %v2289_v33, 16  ;;  %v601_v48 = vshrl.u32 %v2292_v34, 16 }
 0x157   : > { %v583_v57 = vpack.i.b16 %v2286_v32, %v2289_v33  ;;  %v599_v32 = vpack.i.b16 %v2295_v35, %v2292_v34 }
 0x158   : > { %v593_v53 = vshrl.u32 %v545_v40, 16  ;;  %v609_v54 = vshrl.u32 %v546_v41, 16  ;;  %v587_v60 = vpack.i.b16 %v586_v43, %v585_v45  ;;  %v591_v61 = vpack.i.b16 %v579_v39, %v545_v40 }
 0x159   : > { %v603_v0 = vpack.i.b16 %v602_v47, %v601_v48  ;;  %v607_v2 = vpack.i.b16 %v580_v42, %v546_v41  ;;  %v613_v47 = vcombine.low %v583_v57, %v599_v32 }
 0x15a   : > { %v595_v6 = vpack.i.b16 %v594_v52, %v593_v53  ;;  %v611_v7 = vpack.i.b16 %v610_v56, %v609_v54 }
 0x15b   : > { %v621_v42 = vcombine.low %v591_v61, %v607_v2  ;;  %v638_v45 = vcombine.low %v587_v60, %v603_v0  ;;  %v620_v56 = vrot.slane %v613_v47, %v2273_v21 }
 0x15c   : > { %v646_v41 = vcombine.low %v595_v6, %v611_v7 }
 0x15d   : > { %v628_v52 = vrot.slane %v621_v42, %v2273_v21  ;;  %v645_v54 = vrot.slane %v638_v45, %v2273_v21 }
 0x15e   : > { %v653_v35 = vrot.slane %v646_v41, %v2273_v21 }
 0x1be   : > { %v678_v36 = vpop.permute.xlu0 %677 }
 0x1bf   : > { %v724_v49 = vrot.slane %v678_v36, %v2273_v21 }
 0x1c2   : > { %v682_v46 = vpop.permute.xlu0 %681  ;;  %v680_v50 = vpop.permute.xlu1 %679 }
 0x1c3   : > { %v732_v51 = vrot.slane %v682_v46, %v2273_v21  ;;  %v698_v55 = vrot.slane %v680_v50, %v2273_v21 }
 0x1c5   : > { %v733_v58 = vcombine.low %v724_v49, %v732_v51  ;;  %v734_v59 = vcombine.high %v724_v49, %v732_v51  ;;  %v699_v62 = vcombine.low %v690_v44, %v698_v55  ;;  %v700_v63 = vcombine.high %v690_v44, %v698_v55 }
 0x1c7   : > { %v741_v4 = vrot.slane %v733_v58, %v2283_v27  ;;  %v748_v5 = vrot.slane %v734_v59, %v2283_v27  ;;  %v707_v9 = vrot.slane %v699_v62, %v2283_v27  ;;  %v714_v10 = vrot.slane %v700_v63, %v2283_v27 }
 0x1c8   : > { %v654_v58 = vcombine.low %v645_v54, %v653_v35  ;;  %v629_v59 = vcombine.low %v620_v56, %v628_v52 }
 0x1c9   : > { %v749_v14 = vcombine.high %v741_v4, %v2144_v38  ;;  %v750_v15 = vcombine.high %v748_v5, %v2144_v38  ;;  %v756_v16 = vshrl.u32 %v741_v4, 16  ;;  %v772_v17 = vshrl.u32 %v748_v5, 16 }
 0x1ca   : > { %v715_v18 = vcombine.high %v707_v9, %v2144_v38  ;;  %v716_v19 = vcombine.high %v714_v10, %v2144_v38  ;;  %v755_v20 = vshrl.u32 %v707_v9, 16  ;;  %v771_v22 = vshrl.u32 %v714_v10, 16 }
 0x1cb   : > { %v753_v23 = vpack.i.b16 %v741_v4, %v707_v9  ;;  %v764_v24 = vshrl.u32 %v749_v14, 16  ;;  %v769_v25 = vpack.i.b16 %v748_v5, %v714_v10  ;;  %v780_v26 = vshrl.u32 %v750_v15, 16 }
 0x1cc   : > { %v763_v28 = vshrl.u32 %v715_v18, 16  ;;  %v779_v29 = vshrl.u32 %v716_v19, 16  ;;  %v757_v30 = vpack.i.b16 %v756_v16, %v755_v20  ;;  %v761_v31 = vpack.i.b16 %v749_v14, %v715_v18 }
 0x1cd   : > { %v773_v33 = vpack.i.b16 %v772_v17, %v771_v22  ;;  %v777_v36 = vpack.i.b16 %v750_v15, %v716_v19  ;;  %v783_v37 = vcombine.low %v753_v23, %v769_v25  ;;  %v661_v4 = vrot.slane %v654_v58, %v2283_v27 }
 0x1ce   : > { %v765_v39 = vpack.i.b16 %v764_v24, %v763_v28  ;;  %v781_v40 = vpack.i.b16 %v780_v26, %v779_v29  ;;  %v636_v7 = vrot.slane %v629_v59, %v2283_v27 }
 0x1cf   : > { %v791_v43 = vcombine.low %v761_v31, %v777_v36  ;;  %v808_v44 = vcombine.low %v757_v30, %v773_v33  ;;  %v790_v48 = vrot.slane %v783_v37, %v2273_v21  ;;  %v667_v14 = vshrl.u32 %v661_v4, 16 }
 0x1d0   : > { %v816_v46 = vcombine.low %v765_v39, %v781_v40  ;;  %v665_v16 = vpack.i.b16 %v661_v4, %v636_v7  ;;  %v666_v17 = vshrl.u32 %v636_v7, 16  ;;  %v662_v22 = vcombine.high %v661_v4, %v2144_v38 }
 0x1d1   : > { %v798_v49 = vrot.slane %v791_v43, %v2273_v21  ;;  %v815_v50 = vrot.slane %v808_v44, %v2273_v21  ;;  %v637_v24 = vcombine.high %v636_v7, %v2144_v38 }
 0x1d2   : > { %v823_v34 = vrot.slane %v816_v46, %v2273_v21  ;;  %v668_v20 = vpack.i.b16 %v667_v14, %v666_v17  ;;  %v673_v25 = vshrl.u32 %v662_v22, 16 }
 0x1d3   : > { %v799_v51 = vcombine.low %v790_v48, %v798_v49  ;;  %v671_v26 = vpack.i.b16 %v662_v22, %v637_v24  ;;  %v672_v28 = vshrl.u32 %v637_v24, 16 }
 0x1d4   : > { %v824_v53 = vcombine.low %v815_v50, %v823_v34 }
 0x1d5   : > { %v806_v55 = vrot.slane %v799_v51, %v2283_v27  ;;  %v674_v29 = vpack.i.b16 %v673_v25, %v672_v28 }
 0x1d6   : > { %v831_v57 = vrot.slane %v824_v53, %v2283_v27 }
 0x1d7   : > { %v836_v61 = vshrl.u32 %v806_v55, 16  ;;  %v807_v5 = vcombine.high %v806_v55, %v2144_v38 }
 0x1d8   : > { %v835_v60 = vpack.i.b16 %v831_v57, %v806_v55  ;;  %v837_v62 = vshrl.u32 %v831_v57, 16  ;;  %v832_v63 = vcombine.high %v831_v57, %v2144_v38 }
 0x1d9   : > { %v842_v15 = vshrl.u32 %v807_v5, 16 }
 0x1da   : > { %v1020_v0 = vsel %vm1015_vm2, %v835_v60, 0  ;;  %v838_v2 = vpack.i.b16 %v837_v62, %v836_v61  ;;  %v843_v9 = vshrl.u32 %v832_v63, 16  ;;  %v841_v10 = vpack.i.b16 %v832_v63, %v807_v5 }
 0x1db   : > { %2002 = vmatpush3.bf16.xpose.msra.mxu1 %v1020_v0 }
 0x1dc   : > { %v1066_v6 = vsel %vm1015_vm2, %v838_v2, 0  ;;  %2013 = vmatprep.subr.bf16.mxu1 %v2136_v1  ;;  %v844_v18 = vpack.i.b16 %v843_v9, %v842_v15  ;;  %v1112_v19 = vsel %vm1015_vm2, %v841_v10, 0 }
 0x1dd   : > { %2008 = vmatpush3.bf16.xpose.msra.mxu0 %v1066_v6 }
 0x1de   : > { %2019 = vmatprep.subr.bf16.mxu0 %v2136_v1  ;;  %v1158_v23 = vsel %vm1015_vm2, %v844_v18, 0 }
 0x1e2   : > { %2004 = vmatmul.mubr.msk.bf16.vlgmr.msra.gmra.mxu1 %vm1015_vm2, %v665_v16 }
 0x1e3   : > { %2014 = vmatpush3.bf16.xpose.msra.mxu1 %v1112_v19  ;;  %2015 = vmatprep.mubr.msk.bf16.mxu1 %vm2137_vm0, %v2136_v1 }
 0x1e4   : > { %2010 = vmatmul.mubr.msk.bf16.vlgmr.msra.gmra.mxu0 %vm1015_vm2, %v668_v20  ;;  %2025 = vmatprep.subr.bf16.mxu1 %v2136_v1 }
 0x1e5   : > { %2020 = vmatpush3.bf16.xpose.msra.mxu0 %v1158_v23  ;;  %2021 = vmatprep.mubr.msk.bf16.mxu0 %vm2137_vm0, %v2136_v1 }
 0x1e6   : > { %2031 = vmatprep.subr.bf16.mxu0 %v2136_v1 }
 0x1ea   : > { %2016 = vmatmul.mubr.msk.bf16.vlgmr.msra.gmra.mxu1 %vm1015_vm2, %v671_v26 }
 0x1eb   : > { %2027 = vmatprep.mubr.msk.bf16.mxu1 %vm2137_vm0, %v2136_v1 }
 0x1ec   : > { %2022 = vmatmul.mubr.msk.bf16.vlgmr.msra.gmra.mxu0 %vm1015_vm2, %v674_v29 }
 0x1ed   : > { %2033 = vmatprep.mubr.msk.bf16.mxu0 %vm2137_vm0, %v2136_v1 }
 0x2a2   : > { %v1056_v30 = vpop.f32.mrf.mxu1 }
 0x2a3   : > { %v1200_v31 = vsel %vm1015_vm2, %v1056_v30, -inf }
 0x2a4   : > { %1201 = vmax.xlane.f32.xlu1 %v1200_v31  ;;  %v2005_v32 = vpop.f32.mrf.mxu1  ;;  %v1102_v33 = vpop.f32.mrf.mxu0 }
 0x2a5   : > { %v1203_v36 = vsel %vm1015_vm2, %v1102_v33, -inf }
 0x2a6   : > { %v1059_v37 = vpop.f32.mrf.mxu1  ;;  %1204 = vmax.xlane.f32.xlu0 %v1203_v36  ;;  %v2011_v39 = vpop.f32.mrf.mxu0 }
 0x2a8   : > { %v2006_v40 = vpop.f32.mrf.mxu1  ;;  %v1105_v41 = vpop.f32.mrf.mxu0 }
 0x2aa   : > { %v2012_v42 = vpop.f32.mrf.mxu0  ;;  %v1148_v43 = vpop.f32.mrf.mxu1 }
 0x2ab   : > { %v1206_v44 = vsel %vm1015_vm2, %v1148_v43, -inf }
 0x2ac   : > { %v2017_v45 = vpop.f32.mrf.mxu1  ;;  %1207 = vmax.xlane.f32.xlu0 %v1206_v44  ;;  %v1194_v46 = vpop.f32.mrf.mxu0 }
 0x2ad   : > { %v1209_v47 = vsel %vm1015_vm2, %v1194_v46, -inf }
 0x2ae   : > { %v1151_v48 = vpop.f32.mrf.mxu1  ;;  %1210 = vmax.xlane.f32.xlu1 %v1209_v47  ;;  %v2023_v49 = vpop.f32.mrf.mxu0 }
 0x2b0   : > { %v2018_v50 = vpop.f32.mrf.mxu1  ;;  %v1197_v34 = vpop.f32.mrf.mxu0 }
 0x2b2   : > { %v2024_v35 = vpop.f32.mrf.mxu0 }
 0x2bf   : > { %847 = vrot.lane.b32.xlu1 %v2264_v11, %s2145_s24 }
 0x2c2   : > { %845 = vrot.lane.b32.xlu0 %v2258_v8, %s2145_s24 }
 0x32d   : > { %v1202_v51 = vpop.xlane.xlu1 %1201 }
 0x32e   : > { %v1212_v52 = vsub.f32 %v1056_v30, %v1202_v51 }
 0x32f   : > { %v1205_v53 = vpop.xlane.xlu0 %1204 }
 0x330   : > { %v1216_v54 = vmul.f32 1.442695, %v1212_v52  ;;  %v1213_v55 = vsub.f32 %v1102_v33, %v1205_v53 }
 0x332   : > { %2108 = vpow2.f32 %v1216_v54  ;;  %v1218_v56 = vmul.f32 1.442695, %v1213_v55 }
 0x334   : > { %2110 = vpow2.f32 %v1218_v56 }
 0x335   : > { %v1208_v60 = vpop.xlane.xlu0 %1207 }
 0x336   : > { %v1214_v62 = vsub.f32 %v1148_v43, %v1208_v60 }
 0x337   : > { %v1211_v8 = vpop.xlane.xlu1 %1210 }
 0x338   : > { %v1215_v61 = vsub.f32 %v1194_v46, %v1211_v8  ;;  %v1220_v0 = vmul.f32 1.442695, %v1214_v62 }
 0x33a   : > { %v1222_v63 = vmul.f32 1.442695, %v1215_v61 }
 0x33b   : > { %v848_v6 = vpop.permute.xlu1 %847 }
 0x33c   : > { %2112 = vpow2.f32 %v1222_v63  ;;  %v894_v14 = vrot.slane %v848_v6, %v2273_v21 }
 0x33d   : > { %2114 = vpow2.f32 %v1220_v0 }
 0x33f   : > { %v2367_v57 = vpop.eup %2108 }
 0x340   : > { %v1224_v58 = vsel %vm1015_vm2, %v2367_v57, 0.0 }
 0x341   : > { %v2371_v59 = vpop.eup %2110  ;;  %1225 = vadd.xlane.f32.xlu0 %v1224_v58 }
 0x342   : > { %v1227_v11 = vsel %vm1015_vm2, %v2371_v59, 0.0 }
 0x343   : > { %1228 = vadd.xlane.f32.xlu1 %v1227_v11 }
 0x349   : > { %v2377_v2 = vpop.eup %2112 }
 0x34a   : > { %v2379_v4 = vpop.eup %2114  ;;  %v1233_v5 = vsel %vm1015_vm2, %v2377_v2, 0.0 }
 0x354   : > { %849 = vrot.lane.b32.xlu1 %v2269_v13, %s2145_s24  ;;  %v1230_v13 = vsel %vm1015_vm2, %v2379_v4, 0.0 }
 0x357   : > { %851 = vrot.lane.b32.xlu0 %v2267_v12, %s2145_s24  ;;  %v846_v12 = vpop.permute.xlu0 %845 }
 0x358   : > { %v860_v17 = vrot.slane %v846_v12, %v2273_v21 }
 0x376   : > { %1234 = vadd.xlane.f32.xlu0 %v1233_v5 }
 0x378   : > { %1231 = vadd.xlane.f32.xlu1 %v1230_v13 }
 0x3ca   : > { %v1226_v7 = vpop.xlane.xlu0 %1225 }
 0x3cb   : > { %2116 = vrcp.f32 %v1226_v7 }
 0x3cc   : > { %v1229_v9 = vpop.xlane.xlu1 %1228 }
 0x3cd   : > { %2118 = vrcp.f32 %v1229_v9 }
 0x3ce   : > { %v852_v10 = vpop.permute.xlu0 %851 }
 0x3cf   : > { %v902_v15 = vrot.slane %v852_v10, %v2273_v21 }
 0x3d0   : > { %v850_v16 = vpop.permute.xlu1 %849 }
 0x3d1   : > { %v903_v18 = vcombine.low %v894_v14, %v902_v15  ;;  %v904_v19 = vcombine.high %v894_v14, %v902_v15  ;;  %v868_v20 = vrot.slane %v850_v16, %v2273_v21 }
 0x3d3   : > { %v911_v22 = vrot.slane %v903_v18, %v2283_v27  ;;  %v918_v23 = vrot.slane %v904_v19, %v2283_v27  ;;  %v869_v24 = vcombine.low %v860_v17, %v868_v20  ;;  %v870_v25 = vcombine.high %v860_v17, %v868_v20 }
 0x3d5   : > { %v919_v26 = vcombine.high %v911_v22, %v2144_v38  ;;  %v877_v28 = vrot.slane %v869_v24, %v2283_v27  ;;  %v884_v29 = vrot.slane %v870_v25, %v2283_v27  ;;  %v920_v30 = vcombine.high %v918_v23, %v2144_v38 }
 0x3d6   : > { %v926_v31 = vshrl.u32 %v911_v22, 16  ;;  %v942_v40 = vshrl.u32 %v918_v23, 16 }
 0x3d7   : > { %v885_v32 = vcombine.high %v877_v28, %v2144_v38  ;;  %v886_v33 = vcombine.high %v884_v29, %v2144_v38  ;;  %v923_v36 = vpack.i.b16 %v911_v22, %v877_v28  ;;  %v925_v37 = vshrl.u32 %v877_v28, 16 }
 0x3d8   : > { %v934_v39 = vshrl.u32 %v919_v26, 16  ;;  %v939_v41 = vpack.i.b16 %v918_v23, %v884_v29  ;;  %v941_v42 = vshrl.u32 %v884_v29, 16  ;;  %v950_v47 = vshrl.u32 %v920_v30, 16  ;;  %v2117_v60 = vpop.eup %2116 }
 0x3d9   : > { %v927_v43 = vpack.i.b16 %v926_v31, %v925_v37  ;;  %v931_v44 = vpack.i.b16 %v919_v26, %v885_v32  ;;  %v933_v45 = vshrl.u32 %v885_v32, 16  ;;  %v947_v46 = vpack.i.b16 %v920_v30, %v886_v33 }
 0x3da   : > { %v943_v48 = vpack.i.b16 %v942_v40, %v941_v42  ;;  %v949_v49 = vshrl.u32 %v886_v33, 16  ;;  %v953_v50 = vcombine.low %v923_v36, %v939_v41  ;;  %v2119_v62 = vpop.eup %2118  ;;  %v1240_v5 = vmul.f32 %v2117_v60, %v2367_v57 }
 0x3db   : > { %v935_v34 = vpack.i.b16 %v934_v39, %v933_v45  ;;  %v961_v35 = vcombine.low %v931_v44, %v947_v46  ;;  %v1241_v9 = vmul.f32 %v2119_v62, %v2371_v59 }
 0x3dc   : > { %v951_v51 = vpack.i.b16 %v950_v47, %v949_v49  ;;  %v978_v52 = vcombine.low %v927_v43, %v943_v48  ;;  %v960_v53 = vrot.slane %v953_v50, %v2273_v21  ;;  %v1244_v19 = vpack.c.bf16 %v1240_v5, %v1240_v5 }
 0x3dd   : > { %v968_v54 = vrot.slane %v961_v35, %v2273_v21  ;;  %v1245_v20 = vpack.c.bf16 %v1241_v9, %v1241_v9 }
 0x3de   : > { %v986_v55 = vcombine.low %v935_v34, %v951_v51  ;;  %v985_v58 = vrot.slane %v978_v52, %v2273_v21 }
 0x3df   : > { %v969_v56 = vcombine.low %v960_v53, %v968_v54 }
 0x3e0   : > { %v993_v11 = vrot.slane %v986_v55, %v2273_v21 }
 0x3e1   : > { %v976_v8 = vrot.slane %v969_v56, %v2283_v27 }
 0x3e2   : > { %v994_v61 = vcombine.low %v985_v58, %v993_v11  ;;  %v2100_v11 = vld [vmem:[%s2517_s3 + $0x8] sm:$0xff]  }
 0x3e3   : > { %v977_v63 = vcombine.high %v976_v8, %v2144_v38  ;;  %v1006_v12 = vshrl.u32 %v976_v8, 16 }
 0x3e4   : > { %v1001_v0 = vrot.slane %v994_v61, %v2283_v27 }
 0x3e5   : > { %v1012_v10 = vshrl.u32 %v977_v63, 16 }
 0x3e6   : > { %v1005_v13 = vpack.i.b16 %v1001_v0, %v976_v8  ;;  %v1007_v6 = vshrl.u32 %v1001_v0, 16  ;;  %v1002_v7 = vcombine.high %v1001_v0, %v2144_v38 }
 0x3e8   : > { %v1253_v14 = vsel %vm1251_vm3, %v1005_v13, 0  ;;  %v1008_v15 = vpack.i.b16 %v1007_v6, %v1006_v12  ;;  %v1011_v16 = vpack.i.b16 %v1002_v7, %v977_v63  ;;  %v1013_v17 = vshrl.u32 %v1002_v7, 16  ;;  %v2101_v12 = vld [vmem:[%s2517_s3] sm:$0xff]  }
 0x3e9   : > { %2026 = vmatpush3.bf16.msra.mxu1 %v1253_v14 }
 0x3ea   : > { %v1299_v18 = vsel %vm1251_vm3, %v1008_v15, 0  ;;  %2037 = vmatprep.subr.bf16.mxu1 %v2136_v1  ;;  %v1014_v57 = vpack.i.b16 %v1013_v17, %v1012_v10  ;;  %v1345_v38 = vsel %vm1251_vm3, %v1011_v16, 0 }
 0x3eb   : > { %2032 = vmatpush3.bf16.msra.mxu0 %v1299_v18 }
 0x3ec   : > { %2028 = vmatmul.mubr.msk.bf16.vlgmr.msra.gmra.mxu1 %vm1015_vm2, %v1244_v19  ;;  %2043 = vmatprep.subr.bf16.mxu0 %v2136_v1  ;;  %v1391_v59 = vsel %vm1251_vm3, %v1014_v57, 0 }
 0x3ed   : > { %2038 = vmatpush3.bf16.msra.mxu1 %v1345_v38  ;;  %2039 = vmatprep.mubr.msk.bf16.mxu1 %vm2137_vm0, %v2136_v1 }
 0x3ee   : > { %2034 = vmatmul.mubr.msk.bf16.vlgmr.msra.gmra.mxu0 %vm1015_vm2, %v1245_v20  ;;  %2049 = vmatprep.subr.bf16.mxu1 %v2136_v1 }
 0x3ef   : > { %2044 = vmatpush3.bf16.msra.mxu0 %v1391_v59  ;;  %2045 = vmatprep.mubr.msk.bf16.mxu0 %vm2137_vm0, %v2136_v1 }
 0x3f0   : > { %2057 = vmatprep.subr.bf16.mxu0 %v2136_v1 }
 0x3ff   : > { %v1235_v22 = vpop.xlane.xlu0 %1234 }
 0x400   : > { %2120 = vrcp.f32 %v1235_v22 }
 0x401   : > { %v1232_v23 = vpop.xlane.xlu1 %1231 }
 0x402   : > { %2122 = vrcp.f32 %v1232_v23 }
 0x40d   : > { %v2121_v24 = vpop.eup %2120 }
 0x40e   : > { %v1243_v25 = vmul.f32 %v2121_v24, %v2377_v2 }
 0x40f   : > { %v2123_v26 = vpop.eup %2122 }
 0x410   : > { %v1247_v28 = vpack.c.bf16 %v1243_v25, %v1243_v25  ;;  %v1242_v29 = vmul.f32 %v2123_v26, %v2379_v4 }
 0x412   : > { %2046 = vmatmul.mubr.msk.bf16.vlgmr.msra.gmra.mxu0 %vm1015_vm2, %v1247_v28  ;;  %v1246_v30 = vpack.c.bf16 %v1242_v29, %v1242_v29 }
 0x413   : > { %2061 = vmatprep.mubr.msk.bf16.mxu0 %vm2137_vm0, %v2136_v1 }
 0x414   : > { %2040 = vmatmul.mubr.msk.bf16.vlgmr.msra.gmra.mxu1 %vm1015_vm2, %v1246_v30  ;;  %v1943_v30 = vld [vmem:[%s2518_s4] ss:$0 sm:$0xff] }
 0x415   : > { %2053 = vmatprep.mubr.msk.bf16.mxu1 %vm2137_vm0, %v2136_v1  ;;  %2050 = vmatpush3.bf16.msra.mxu1 %v2100_v11  ;;  %v1949_v11 = vld [vmem:[%s2522_s8] ss:$0 sm:$0xff] }
 0x416   : > { %2051 = vmatprep.subr.bf16.mxu1 %v2136_v1 }
 0x419   : > { %2052 = vmatpush3.bf16.msra.mxu1 %v2101_v12 }
 0x41a   : > { %2065 = vmatprep.subr.bf16.mxu1 %v2136_v1 }
 0x4ac   : > { %v1289_v31 = vpop.f32.mrf.mxu1 }
 0x4ae   : > { %v2029_v32 = vpop.f32.mrf.mxu1  ;;  %v1335_v33 = vpop.f32.mrf.mxu0 }
 0x4b0   : > { %v1292_v36 = vpop.f32.mrf.mxu1  ;;  %v2035_v2 = vpop.f32.mrf.mxu0 }
 0x4b2   : > { %v2030_v37 = vpop.f32.mrf.mxu1  ;;  %v1338_v39 = vpop.f32.mrf.mxu0 }
 0x4b4   : > { %v2036_v40 = vpop.f32.mrf.mxu0 }
 0x4d2   : > { %v1427_v4 = vpop.f32.mrf.mxu0 }
 0x4d3   : > { %v1449_v41 = vcombine.low %v1335_v33, %v1427_v4  ;;  %v1450_v42 = vcombine.high %v1335_v33, %v1427_v4 }
 0x4d4   : > { %v1381_v43 = vpop.f32.mrf.mxu1  ;;  %v2047_v44 = vpop.f32.mrf.mxu0 }
 0x4d5   : > { %v1433_v45 = vcombine.low %v1289_v31, %v1381_v43  ;;  %v1434_v46 = vcombine.high %v1289_v31, %v1381_v43  ;;  %v1457_v49 = vrot.slane %v1449_v41, %v2273_v21  ;;  %v1464_v50 = vrot.slane %v1450_v42, %v2273_v21 }
 0x4d6   : > { %v2041_v47 = vpop.f32.mrf.mxu1  ;;  %v1430_v48 = vpop.f32.mrf.mxu0  ;;  %v438_v31 = vunpack.c.l.bf16 %v2249_v3  ;;  %v2102_v3 = vld [vmem:[%s2521_s7 + $0x8] sm:$0xff]  }
 0x4d7   : > { %v1441_v34 = vrot.slane %v1433_v45, %v2273_v21  ;;  %v1448_v35 = vrot.slane %v1434_v46, %v2273_v21  ;;  %2058 = vmatpush3.bf16.msra.mxu0 %v2102_v3  ;;  %v2103_v45 = vld [vmem:[%s2521_s7] sm:$0xff]   ;;  %v2104_v46 = vld [vmem:[%s2523_s9 + $0x18] sm:$0xff]   ;;  %v2105_v47 = vld [vmem:[%s2523_s9 + $0x10] sm:$0xff]  }
 0x4d8   : > { %v1384_v51 = vpop.f32.mrf.mxu1  ;;  %v2048_v52 = vpop.f32.mrf.mxu0  ;;  %2059 = vmatprep.subr.bf16.mxu0 %v2136_v1 }
 0x4d9   : > { %v1465_v53 = vcombine.low %v1441_v34, %v1457_v49  ;;  %v1466_v54 = vcombine.high %v1441_v34, %v1457_v49  ;;  %v1481_v55 = vcombine.low %v1448_v35, %v1464_v50  ;;  %v1482_v56 = vcombine.high %v1448_v35, %v1464_v50  ;;  %v1947_v35 = vld [vmem:[%s2519_s5] ss:$0 sm:$0xff] }
 0x4da   : > { %v2042_v58 = vpop.f32.mrf.mxu1  ;;  %v1948_v52 = vld [vmem:[%s2520_s6] ss:$0 sm:$0xff] }
 0x4db   : > { %v1473_v8 = vrot.slane %v1465_v53, %v2283_v27  ;;  %v1480_v60 = vrot.slane %v1466_v54, %v2283_v27  ;;  %v1489_v61 = vrot.slane %v1481_v55, %v2283_v27  ;;  %v1496_v62 = vrot.slane %v1482_v56, %v2283_v27  ;;  %2060 = vmatpush3.bf16.msra.mxu0 %v2103_v45  ;;  %v2106_v56 = vld [vmem:[%s2523_s9 + $0x8] sm:$0xff]   ;;  %v2107_v58 = vld [vmem:[%s2523_s9] sm:$0xff]  }
 0x4dd   : > { %v1501_v63 = vcombine.low %v1473_v8, %v1480_v60  ;;  %v1941_v0 = vcombine.high %v1473_v8, %v1480_v60  ;;  %v1517_v5 = vcombine.low %v1489_v61, %v1496_v62  ;;  %v1942_v13 = vcombine.high %v1489_v61, %v1496_v62 }
 0x4df   : > { %v1508_v6 = vrot.slane %v1501_v63, %v2273_v21  ;;  %v1516_v7 = vrot.slane %v1941_v0, %v2273_v21  ;;  %v1524_v9 = vrot.slane %v1517_v5, %v2273_v21  ;;  %v1532_v10 = vrot.slane %v1942_v13, %v2273_v21 }
 0x4e1   : > { %v1534_v14 = vcombine.high %v1508_v6, %v1516_v7  ;;  %v1550_v15 = vcombine.high %v1524_v9, %v1532_v10  ;;  %v1533_v16 = vcombine.low %v1508_v6, %v1516_v7  ;;  %v1549_v17 = vcombine.low %v1524_v9, %v1532_v10 }
 0x4e3   : > { %v1548_v18 = vrot.slane %v1534_v14, %v2283_v27  ;;  %v1564_v19 = vrot.slane %v1550_v15, %v2283_v27  ;;  %v1541_v57 = vrot.slane %v1533_v16, %v2283_v27  ;;  %v1557_v38 = vrot.slane %v1549_v17, %v2283_v27 }
 0x4e5   : > { %v1567_v20 = vcombine.low %v1548_v18, %v1564_v19  ;;  %v1566_v59 = vcombine.high %v1541_v57, %v1557_v38  ;;  %v1565_v22 = vcombine.low %v1541_v57, %v1557_v38  ;;  %v1568_v21 = vcombine.high %v1548_v18, %v1564_v19 }
 0x4e7   : > { %1574 = vrot.lane.b32.xlu1 %v1567_v20, %s2146_s15  ;;  %1570 = vrot.lane.b32.xlu0 %v1566_v59, %s2147_s16 }
 0x4eb   : > { %1578 = vrot.lane.b32.xlu1 %v1568_v21, %s2148_s17 }
 0x559   : > { %v1575_v23 = vpop.permute.xlu1 %1574  ;;  %v1571_v24 = vpop.permute.xlu0 %1570 }
 0x55a   : > { %v1581_v25 = vsel %vm1015_vm2, %v1565_v22, %v1571_v24  ;;  %v1959_v22 = vld [vmem:[%s2525_s11] ss:$0 sm:$0xff] }
 0x55b   : > { %v1583_v28 = vsel %vm1582_vm4, %v1581_v25, %v1575_v23  ;;  %v1960_v23 = vld [vmem:[%s2526_s12] ss:$0 sm:$0xff] }
 0x55d   : > { %v1579_v26 = vpop.permute.xlu1 %1578 }
 0x55e   : > { %v1585_v29 = vsel %vm1584_vm5, %v1583_v28, %v1579_v26 }
 0x55f   : > { %v1590_v27 = vpack.c.bf16 %v1585_v29, %v1585_v29 }
 0x561   : > { %2054 = vmatmul.mubr.msk.bf16.vlgmr.msra.gmra.mxu1 %vm462_vm1, %v1590_v27 }
 0x562   : > { %2073 = vmatprep.mubr.msk.bf16.mxu1 %vm2137_vm0, %v2136_v1  ;;  %2066 = vmatpush3.bf16.msra.mxu1 %v2104_v46 }
 0x563   : > { %2067 = vmatprep.subr.bf16.mxu1 %v2136_v1 }
 0x566   : > { %2068 = vmatpush3.bf16.msra.mxu1 %v2105_v47 }
 0x567   : > { %2069 = vmatprep.subr.bf16.mxu1 %v2136_v1 }
 0x56a   : > { %2070 = vmatpush3.bf16.msra.mxu1 %v2106_v56 }
 0x56b   : > { %2071 = vmatprep.subr.bf16.mxu1 %v2136_v1  ;;  %v1953_v1 = vld [vmem:[%s2524_s10] ss:$0 sm:$0xff] }
 0x56e   : > { %2072 = vmatpush3.bf16.msra.mxu1 %v2107_v58 }
 0x621   : > { %v1647_v32 = vpop.f32.mrf.mxu1 }
 0x622   : > { %v1648_v33 = vadd.f32 %v1943_v30, %v1647_v32 }
 0x623   : > { %v2055_v36 = vpop.f32.mrf.mxu1 }
 0x624   : > { %v1653_v2 = vadd.f32 %v1648_v33, %v438_v31 }
 0x625   : > { %v1650_v37 = vpop.f32.mrf.mxu1 }
 0x626   : > { %v1654_v39 = vsel %vm462_vm1, %v1653_v2, 0.0 }
 0x627   : > { %v2056_v40 = vpop.f32.mrf.mxu1  ;;  %1655 = vadd.xlane.f32.xlu0 %v1654_v39 }
 0x6b0   : > { %v1656_v4 = vpop.xlane.xlu0 %1655 }
 0x6b1   : > { %v1658_v41 = vmul.f32 0.03125, %v1656_v4 }
 0x6b3   : > { %v1659_v42 = vsub.f32 %v1653_v2, %v1658_v41 }
 0x6b5   : > { %v1660_v43 = vmul.f32 %v1659_v42, %v1659_v42 }
 0x6b7   : > { %v1661_v44 = vsel %vm462_vm1, %v1660_v43, 0.0 }
 0x6b8   : > { %1662 = vadd.xlane.f32.xlu1 %v1661_v44 }
 0x741   : > { %v1663_v48 = vpop.xlane.xlu1 %1662 }
 0x742   : > { %v1664_v49 = vmul.f32 0.03125, %v1663_v48 }
 0x744   : > { %v1665_v50 = vadd.f32 1e-05, %v1664_v49 }
 0x746   : > { %2124 = vrsqrt.f32 %v1665_v50 }
 0x753   : > { %v2125_v34 = vpop.eup %2124 }
 0x754   : > { %v1667_v51 = vmul.f32 %v2125_v34, %v1659_v42 }
 0x756   : > { %v1675_v53 = vmul.f32 %v1947_v35, %v1667_v51 }
 0x758   : > { %v1683_v54 = vadd.f32 %v1948_v52, %v1675_v53 }
 0x75a   : > { %v1688_v55 = vpack.c.bf16 %v1683_v54, %v1683_v54 }
 0x75c   : > { %2062 = vmatmul.mubr.msk.bf16.vlgmr.msra.gmra.mxu0 %vm462_vm1, %v1688_v55 }
 0x81c   : > { %v1745_v8 = vpop.f32.mrf.mxu0 }
 0x81d   : > { %v1746_v60 = vadd.f32 %v1949_v11, %v1745_v8 }
 0x81e   : > { %v2063_v61 = vpop.f32.mrf.mxu0 }
 0x81f   : > { %v1751_v62 = vmax.f32 %v1746_v60, 0.0 }
 0x820   : > { %v1748_v63 = vpop.f32.mrf.mxu0 }
 0x821   : > { %v1752_v0 = vpack.c.bf16 %v1751_v62, %v1751_v62 }
 0x822   : > { %v2064_v5 = vpop.f32.mrf.mxu0 }
 0x823   : > { %2074 = vmatmul.mubr.msk.bf16.vlgmr.msra.gmra.mxu1 %vm1792_vm6, %v1752_v0 }
 0x8e3   : > { %v1830_v13 = vpop.f32.mrf.mxu1 }
 0x8e4   : > { %v1831_v12 = vadd.f32 %v1953_v1, %v1830_v13 }
 0x8e5   : > { %v2075_v6 = vpop.f32.mrf.mxu1 }
 0x8e6   : > { %v1836_v7 = vadd.f32 %v1831_v12, %v1683_v54 }
 0x8e7   : > { %v1833_v9 = vpop.f32.mrf.mxu1 }
 0x8e8   : > { %v1837_v10 = vsel %vm462_vm1, %v1836_v7, 0.0 }
 0x8e9   : > { %1838 = vadd.xlane.f32.xlu0 %v1837_v10  ;;  %v2076_v14 = vpop.f32.mrf.mxu1 }
 0x972   : > { %v1839_v15 = vpop.xlane.xlu0 %1838 }
 0x973   : > { %v1840_v16 = vmul.f32 0.03125, %v1839_v15 }
 0x975   : > { %v1841_v17 = vsub.f32 %v1836_v7, %v1840_v16 }
 0x977   : > { %v1842_v18 = vmul.f32 %v1841_v17, %v1841_v17 }
 0x979   : > { %v1843_v19 = vsel %vm462_vm1, %v1842_v18, 0.0 }
 0x97a   : > { %1844 = vadd.xlane.f32.xlu0 %v1843_v19 }
 0xa03   : > { %v1845_v57 = vpop.xlane.xlu0 %1844 }
 0xa04   : > { %v1846_v38 = vmul.f32 0.03125, %v1845_v57 }
 0xa06   : > { %v1847_v20 = vadd.f32 1e-05, %v1846_v38 }
 0xa08   : > { %2126 = vrsqrt.f32 %v1847_v20 }
 0xa15   : > { %v2127_v59 = vpop.eup %2126 }
 0xa16   : > { %v1849_v21 = vmul.f32 %v2127_v59, %v1841_v17 }
 0xa18   : > { %v1857_v24 = vmul.f32 %v1959_v22, %v1849_v21 }
 0xa1a   : > { %v1865_v25 = vadd.f32 %v1960_v23, %v1857_v24 }
 0xa1c   : > { %v1866_v26 = vpack.c.bf16 %v1865_v25, %v1865_v25 }
 0xa1e   : > { %1868 = vst.msk [vmem:[%s435_s18] sm:$0xf] %vm1867_vm7, %v1866_v26 }
 0xa1f PF: > { %s23_s25 = sadd.s32 1, %s2134_s25  }
 0xa20   : > { %p20_p4 = scmp.ge.s32.totalorder %s23_s25, 4  }
 0xa22   :  { %22 = sbr.rel (!%p20_p4) target bundleno = 1 (0x1), region = 102 }

</bundles_post_ra>
